<compile_context>
chip_gen: v5e
topology: v5e:2x2
jax: 0.10.0
libtpu: 0.0.40
codegen_flags: <defaults>
</compile_context>

<pallas_src>
import functools

import jax
import jax.numpy as jnp
from jax.experimental import pallas as pl
from jax.experimental.pallas import tpu as pltpu


# ---------------------------------------------------------------------------
# VMEM budget / tile selection
# ---------------------------------------------------------------------------
def _vmem_budget():
    """Usable scoped-VMEM budget in bytes (generation aware, conservative)."""
    cap = 64 << 20  # conservative fallback: v7x per-TC physical VMEM
    try:
        info = pltpu.get_tpu_info()
        cap = int(getattr(info, "vmem_capacity_bytes", cap)) or cap
    except Exception:
        pass
    budget = (cap * 3) // 4            # leave 25% headroom for compiler scratch
    return int(min(96 << 20, max(32 << 20, budget)))


def _pick_hw_tile(hw, c, itemsize, budget, target_bytes=8 << 20, max_lanes=None):
    """Lane-aligned HW tile for the two-pass path.

    Prefers a multiple-of-128 tile that divides HW (no masked tail); otherwise
    returns a lane-aligned tile and the caller uses a cdiv grid + masked tail.
    """
    if max_lanes is None:
        max_bytes = min(target_bytes, max(512 << 10, (budget - (8 << 20)) // 6))
        max_lanes = max(128, (max_bytes // max(1, c * itemsize)) // 128 * 128)
    if hw <= max_lanes:
        return hw                       # single full-extent block along HW
    t = min(max_lanes, (hw // 128) * 128)
    for cand in range(t, max(127, t // 2), -128):
        if hw % cand == 0:
            return cand                 # exact divisor close to the target
    return t                            # cdiv grid + masked tail tile


# ---------------------------------------------------------------------------
# Kernels
# ---------------------------------------------------------------------------
def _se_fused_kernel(x_ref, w1t_ref, w2t_ref, o_ref, *, inv_hw):
    # x_ref:   (Nb, C, HW)  current batch-group slab (read once)
    # w1t_ref: (C, Cr)      fc1 weight, pre-transposed:  h = s @ w1t
    # w2t_ref: (Cr, C)      fc2 weight, pre-transposed:  g = sigmoid(h @ w2t)
    # o_ref:   (Nb, C, HW)
    x = x_ref[...]
    s = jnp.sum(x.astype(jnp.float32), axis=-1) * inv_hw          # (Nb, C)
    h = jnp.maximum(
        jnp.dot(s, w1t_ref[...].astype(jnp.float32),
                preferred_element_type=jnp.float32), 0.0)         # (Nb, Cr)
    g = jax.nn.sigmoid(
        jnp.dot(h, w2t_ref[...].astype(jnp.float32),
                preferred_element_type=jnp.float32))              # (Nb, C)
    o_ref[...] = x * g[:, :, None].astype(o_ref.dtype)


def _squeeze_kernel(x_ref, s_ref, acc_ref, *, inv_hw, hw, t_hw):
    # x_ref:  (1, C, t_hw)  current (batch, hw-tile) slab
    # s_ref:  (1, C, 1)     per-channel mean (f32), resident across hw tiles
    # acc_ref:(C, 1)        f32 running spatial sum (scratch)
    t = pl.program_id(1)

    @pl.when(t == 0)
    def _():
        acc_ref[...] = jnp.zeros_like(acc_ref)

    xv = x_ref[0]                                                  # (C, t_hw)
    if hw % t_hw:  # compile-time: tail tile of a cdiv grid needs a lane mask
        lane = jax.lax.broadcasted_iota(jnp.int32, xv.shape, 1)
        valid = (t * t_hw + lane) < hw
        xv = jnp.where(valid, xv, jnp.zeros_like(xv))
    acc_ref[...] += jnp.sum(xv.astype(jnp.float32), axis=-1, keepdims=True)

    @pl.when(t == pl.num_programs(1) - 1)
    def _():
        s_ref[0] = acc_ref[...] * inv_hw


def _scale_kernel(x_ref, g_ref, o_ref):
    # x_ref: (1, C, t_hw), g_ref: (1, C, 1) f32, o_ref: (1, C, t_hw)
    o_ref[...] = x_ref[...] * g_ref[...].astype(o_ref.dtype)


# ---------------------------------------------------------------------------
# Wrapper
# ---------------------------------------------------------------------------
def se_module(x_nchw, w_fc1, w_fc2, *, force_two_pass=False, _max_tile_lanes=None):
    """SEModule forward.

    x_nchw: (N, C, H, W)
    w_fc1:  (Cr, C, 1, 1)  -- Conv2d(C, Cr, 1, bias=False) weight
    w_fc2:  (C, Cr, 1, 1)  -- Conv2d(Cr, C, 1, bias=False) weight
    returns (N, C, H, W)
    """
    N, C, H, W = x_nchw.shape
    Cr = w_fc1.shape[0]
    HW = H * W
    itemsize = jnp.dtype(x_nchw.dtype).itemsize

    # Free (contiguous) reshapes only -- no layout round trip through HBM.
    x = x_nchw.reshape(N, C, HW)
    w1t = w_fc1.reshape(Cr, C).T          # (C, Cr):  fc1(s) == s @ w1t
    w2t = w_fc2.reshape(C, Cr).T          # (Cr, C):  fc2(h) == h @ w2t
    w_bytes = (w1t.size + w2t.size) * jnp.dtype(w_fc1.dtype).itemsize

    budget = _vmem_budget()
    slab1 = C * HW * itemsize             # bytes of one batch element's slab

    fused_ok = (not force_two_pass) and (6 * slab1 + w_bytes + (8 << 20) <= budget)

    if fused_ok:
        # ---- fused single pass: read x once, squeeze+excite+scale, write once
        target = 8 << 20
        nb_max = max(1, min(target // slab1,
                            (budget - w_bytes - (8 << 20)) // (6 * slab1)))
        if N >= 2:
            nb_max = min(nb_max, max(1, N // 2))   # keep >=2 steps for megacore
        nb = 1
        for d in range(int(min(nb_max, N)), 0, -1):
            if N % d == 0:
                nb = d
                break
        block_bytes = nb * slab1
        vmem = int(min(budget, max(32 << 20, 6 * block_bytes + w_bytes + (8 << 20))))
        out = pl.pallas_call(
            functools.partial(_se_fused_kernel, inv_hw=1.0 / float(HW)),
            out_shape=jax.ShapeDtypeStruct((N, C, HW), x.dtype),
            grid_spec=pltpu.PrefetchScalarGridSpec(
                num_scalar_prefetch=0,
                grid=(N // nb,),
                in_specs=[
                    pl.BlockSpec((nb, C, HW), lambda i: (i, 0, 0)),
                    pl.BlockSpec((C, Cr), lambda i: (0, 0)),
                    pl.BlockSpec((Cr, C), lambda i: (0, 0)),
                ],
                out_specs=pl.BlockSpec((nb, C, HW), lambda i: (i, 0, 0)),
            ),
            compiler_params=pltpu.CompilerParams(
                dimension_semantics=("parallel",),
                vmem_limit_bytes=vmem),
        )(x, w1t, w2t)
        return out.reshape(N, C, H, W)

    # ---- two-pass fallback (slab too large for VMEM residency) --------------
    t_hw = _pick_hw_tile(HW, C, itemsize, budget, max_lanes=_max_tile_lanes)
    n_hw = pl.cdiv(HW, t_hw)
    block_bytes = C * t_hw * itemsize

    # pass 1: squeeze (global mean over H*W) -> means: (N, C, 1) f32
    vmem1 = int(min(budget, max(32 << 20, 4 * block_bytes + (8 << 20))))
    means = pl.pallas_call(
        functools.partial(_squeeze_kernel, inv_hw=1.0 / float(HW), hw=HW, t_hw=t_hw),
        out_shape=jax.ShapeDtypeStruct((N, C, 1), jnp.float32),
        grid_spec=pltpu.PrefetchScalarGridSpec(
            num_scalar_prefetch=0,
            grid=(N, n_hw),
            in_specs=[pl.BlockSpec((1, C, t_hw), lambda n, t: (n, 0, t))],
            out_specs=pl.BlockSpec((1, C, 1), lambda n, t: (n, 0, 0)),
            scratch_shapes=[pltpu.VMEM((C, 1), jnp.float32)],
        ),
        compiler_params=pltpu.CompilerParams(
            dimension_semantics=("parallel", "arbitrary"),
            vmem_limit_bytes=vmem1),
    )(x)

    # excite: one tiny batched matmul chain, plain XLA (keeps weights and the
    # degenerate column matmuls out of the streaming kernels).
    s = means[:, :, 0]
    h = jnp.maximum(jnp.dot(s, w1t.astype(jnp.float32)), 0.0)     # (N, Cr)
    g = jax.nn.sigmoid(jnp.dot(h, w2t.astype(jnp.float32)))       # (N, C) f32
    g = g[:, :, None]                                             # (N, C, 1)

    # pass 2: broadcast scale, tiled over (N, HW) -- both axes parallel
    vmem2 = int(min(budget, max(32 << 20, 6 * block_bytes + (8 << 20))))
    out = pl.pallas_call(
        _scale_kernel,
        out_shape=jax.ShapeDtypeStruct((N, C, HW), x.dtype),
        grid_spec=pltpu.PrefetchScalarGridSpec(
            num_scalar_prefetch=0,
            grid=(N, n_hw),
            in_specs=[
                pl.BlockSpec((1, C, t_hw), lambda n, t: (n, 0, t)),
                pl.BlockSpec((1, C, 1), lambda n, t: (n, 0, 0)),
            ],
            out_specs=pl.BlockSpec((1, C, t_hw), lambda n, t: (n, 0, t)),
        ),
        compiler_params=pltpu.CompilerParams(
            dimension_semantics=("parallel", "parallel"),
            vmem_limit_bytes=vmem2),
    )(x, g)

    return out.reshape(N, C, H, W)


# ---------------------------------------------------------------------------
# Reference + self-test
# ---------------------------------------------------------------------------
def _reference(x_nchw, w_fc1, w_fc2):
    N, C, H, W = x_nchw.shape
    Cr = w_fc1.shape[0]
    s = jnp.mean(x_nchw.astype(jnp.float32), axis=(2, 3))              # (N, C)
    h = jnp.maximum(s @ w_fc1.reshape(Cr, C).T.astype(jnp.float32), 0.0)
    g = jax.nn.sigmoid(h @ w_fc2.reshape(C, Cr).T.astype(jnp.float32))
    return x_nchw * g[:, :, None, None].astype(x_nchw.dtype)


if __name__ == "__main__":
    def run_case(n, c, h, w, reduction, force_two_pass=False,
                 max_tile_lanes=None, seed=0):
        cr = c // reduction
        key = jax.random.PRNGKey(seed)
        kx, k1, k2 = jax.random.split(key, 3)
        xx = jax.random.normal(kx, (n, c, h, w), dtype=jnp.float32)
        w1 = jax.random.normal(k1, (cr, c, 1, 1), dtype=jnp.float32) * 0.5
        w2 = jax.random.normal(k2, (c, cr, 1, 1), dtype=jnp.float32) * 0.5
        out = jax.block_until_ready(
            se_module(xx, w1, w2, force_two_pass=force_two_pass,
                      _max_tile_lanes=max_tile_lanes))
        ref = _reference(xx, w1, w2)
        assert out.shape == xx.shape
        assert jnp.allclose(out, ref, atol=2e-5, rtol=2e-5), \
            f"mismatch vs reference for case {(n, c, h, w, reduction, force_two_pass)}"

    # Primary: SEModule(channels=4, reduction=2) -- fused single-pass path.
    run_case(2, 4, 16, 16, 2, seed=0)
    # Common small-SE stage (7x7 map), fused path with non-128 lane extent.
    run_case(2, 8, 7, 7, 2, seed=1)
    # Multi-n fused blocks (Nb > 1).
    run_case(4, 8, 7, 7, 2, seed=2)
    # Two-pass fallback with a masked tail tile (HW=169, tile=128).
    run_case(2, 8, 13, 13, 2, force_two_pass=True, max_tile_lanes=128, seed=3)

    print("KERNEL_OK")
</pallas_src>

<mosaic_0001>
module attributes {stable_mosaic.version = 11 : i64} {
  func.func @_se_fused_kernel(%arg0: i32, %arg1: memref<1x4x256xf32, #tpu.memory_space<vmem>>, %arg2: memref<4x2xf32, #tpu.memory_space<vmem>>, %arg3: memref<2x4xf32, #tpu.memory_space<vmem>>, %arg4: memref<1x4x256xf32, #tpu.memory_space<vmem>>) attributes {dimension_semantics = [#tpu.dimension_semantics<parallel>], iteration_bounds = array<i64: 2>, scalar_prefetch = 0 : i64, scratch_operands = 0 : i64, tpu.core_type = #tpu.core_type<tc>, window_params = [{transform_indices = @transform_0, window_bounds = array<i64: 1, 4, 256>}, {pipeline_mode = #tpu.pipeline_mode<synchronous>, transform_indices = @transform_1, window_bounds = array<i64: 4, 2>}, {pipeline_mode = #tpu.pipeline_mode<synchronous>, transform_indices = @transform_2, window_bounds = array<i64: 2, 4>}, {transform_indices = @transform_3, window_bounds = array<i64: 1, 4, 256>}]} {
    %c0 = arith.constant 0 : index
    %c0_0 = arith.constant 0 : index
    %c0_1 = arith.constant 0 : index
    %0 = vector.load %arg1[%c0, %c0_0, %c0_1] : memref<1x4x256xf32, #tpu.memory_space<vmem>>, vector<1x4x256xf32>
    %cst = arith.constant dense<0.000000e+00> : vector<1x4xf32>
    %1 = vector.multi_reduction <add>, %0, %cst [2] : vector<1x4x256xf32> to vector<1x4xf32>
    %cst_2 = arith.constant 3.906250e-03 : f32
    %2 = vector.broadcast %cst_2 : f32 to vector<1x4xf32>
    %3 = arith.mulf %1, %2 : vector<1x4xf32>
    %c0_3 = arith.constant 0 : index
    %c0_4 = arith.constant 0 : index
    %4 = vector.load %arg2[%c0_3, %c0_4] : memref<4x2xf32, #tpu.memory_space<vmem>>, vector<4x2xf32>
    %cst_5 = arith.constant dense<0.000000e+00> : vector<1x2xf32>
    %5 = tpu.matmul %3, %4, %cst_5 {dimension_numbers = #tpu.dot_dimension_numbers<[1], [0], [0], [1], [0, 0, 1, 1], [], []>} : vector<1x4xf32>, vector<4x2xf32>, vector<1x2xf32> -> vector<1x2xf32>
    %cst_6 = arith.constant 0.000000e+00 : f32
    %6 = vector.broadcast %cst_6 : f32 to vector<1x2xf32>
    %7 = arith.maximumf %5, %6 : vector<1x2xf32>
    %c0_7 = arith.constant 0 : index
    %c0_8 = arith.constant 0 : index
    %8 = vector.load %arg3[%c0_7, %c0_8] : memref<2x4xf32, #tpu.memory_space<vmem>>, vector<2x4xf32>
    %cst_9 = arith.constant dense<0.000000e+00> : vector<1x4xf32>
    %9 = tpu.matmul %7, %8, %cst_9 {dimension_numbers = #tpu.dot_dimension_numbers<[1], [0], [0], [1], [0, 0, 1, 1], [], []>} : vector<1x2xf32>, vector<2x4xf32>, vector<1x4xf32> -> vector<1x4xf32>
    %10 = arith.negf %9 : vector<1x4xf32>
    %11 = math.exp %10 : vector<1x4xf32>
    %cst_10 = arith.constant 1.000000e+00 : f32
    %12 = vector.broadcast %cst_10 : f32 to vector<1x4xf32>
    %13 = arith.addf %12, %11 : vector<1x4xf32>
    %14 = arith.divf %12, %13 : vector<1x4xf32>
    %15 = vector.shape_cast %14 : vector<1x4xf32> to vector<1x4x1xf32>
    %16 = vector.broadcast %15 : vector<1x4x1xf32> to vector<1x4x256xf32>
    %17 = arith.mulf %0, %16 : vector<1x4x256xf32>
    %c0_11 = arith.constant 0 : index
    %c0_12 = arith.constant 0 : index
    %c0_13 = arith.constant 0 : index
    %18 = vector.load %arg4[%c0_11, %c0_12, %c0_13] : memref<1x4x256xf32, #tpu.memory_space<vmem>>, vector<1x4x256xf32>
    tpu.vector_store %arg4[%c0_11, %c0_12, %c0_13], %17 {strides = array<i32>} : memref<1x4x256xf32, #tpu.memory_space<vmem>>, vector<1x4x256xf32>,
    return
  }
  func.func @transform_0(%arg0: i32) -> (i32, i32, i32) {
    %c0_i32 = arith.constant 0 : i32
    %c0_i32_0 = arith.constant 0 : i32
    %c0_i32_1 = arith.constant 0 : i32
    return %arg0, %c0_i32, %c0_i32_0 : i32, i32, i32
  }
  func.func @transform_1(%arg0: i32) -> (i32, i32) {
    %c0_i32 = arith.constant 0 : i32
    %c0_i32_0 = arith.constant 0 : i32
    %c0_i32_1 = arith.constant 0 : i32
    return %c0_i32, %c0_i32_0 : i32, i32
  }
  func.func @transform_2(%arg0: i32) -> (i32, i32) {
    %c0_i32 = arith.constant 0 : i32
    %c0_i32_0 = arith.constant 0 : i32
    %c0_i32_1 = arith.constant 0 : i32
    return %c0_i32, %c0_i32_0 : i32, i32
  }
  func.func @transform_3(%arg0: i32) -> (i32, i32, i32) {
    %c0_i32 = arith.constant 0 : i32
    %c0_i32_0 = arith.constant 0 : i32
    %c0_i32_1 = arith.constant 0 : i32
    return %arg0, %c0_i32, %c0_i32_0 : i32, i32, i32
  }
}

</mosaic_0001>

<bundles_post_ra>
// kernel: tpu_custom_call.1
= control target key start
LH: loop header
LB: loop body
LE: loop exit
PB: predicated region body
PF: predicated region fallthrough
CT: control target
= control target key end

     0   :  { %8 = vsyncpa [#allocation3], 0  ;;  %s714_s0 = inlined_call_operand.hbm [shape: f32[2,4,256], index: 0, kind: input, shape index: {}]   ;;  %s715_s1 = inlined_call_operand.vmem [shape: f32[4,2], index: 1, kind: input, shape index: {}]   ;;  %s716_s2 = inlined_call_operand.vmem [shape: f32[2,4], index: 2, kind: input, shape index: {}]   ;;  %s717_s3 = inlined_call_operand.hbm [shape: f32[2,4,256], index: 3, kind: output, shape index: {}]  }
   0x1   :  { %10 = vsyncpa [#allocation3 + $0x1], 0 }
   0x2   :  { %11 = vsyncpa [#allocation4], 0 }
   0x3   :  { %13 = vsyncpa [#allocation4 + $0x1], 0  ;;  %s577_s12 = smov 0   ;;  %s579_s13 = smov 0  }
   0x4   :  { %s581_s14 = smov 0   ;;  %s583_s15 = smov 0  }
   0x5 LB: > { %s598_s16 = sadd.s32 4294967295, %s554_s15   ;;  %s385_s17 = sadd.s32 4294967294, %s554_s15   ;;  %s554_s15 = sphi %s583_s15, %s727_s15   ;;  %s550_s14 = sphi %s581_s14, %s726_s14   ;;  %s546_s13 = sphi %s579_s13, %s725_s13   ;;  %s542_s12 = sphi %s577_s12, %s724_s12  }
   0x6   : > { %s602_s18 = sadd.s32 1, %s554_s15   ;;  %s26_s19 = sadd.s32 1, %s550_s14 }
   0x7   : > { %s23_s20 = ssub.s32 %s554_s15, %s602_s18  ;;  %p33_p0 = scmp.ne.s32.totalorder %s550_s14, %s546_s13 }
   0x8   : > { %p24_p1 = scmp.eq.s32.totalorder %s23_s20, 0  ;;  %p34_p2 = scmp.eq.s32.totalorder %s554_s15, 0 }
   0x9   : > { %p39_p3 = scmp.ne.s32.totalorder %s546_s13, %s542_s12  ;;  %p40_p4 = scmp.eq.s32.totalorder %s598_s16, 0 }
   0xa   : > { %s614_s21 = scalar_select %p24_p1, %s550_s14, %s26_s19  }
   0xb   : > { %p616_p5 = por %p34_p2, %p33_p0  ;;  %p620_p6 = por %p40_p4, %p39_p3 }
   0xc   : > { %p105_p7 = scmp.eq.s32.totalorder %s598_s16, 1  ;;  %p111_p8 = scmp.eq.s32.totalorder %s385_s17, 1 }
   0xd   : > { %p418_p10 = scmp.lt.s32.totalorder %s554_s15, 2  ;;  %s137_s26 = sand.u32 1, %s550_s14  }
   0xe   : > { %p627_p11 = por %p105_p7, %p33_p0  ;;  %p631_p12 = por %p111_p8, %p39_p3 }
   0xf   : > { %s404_s27 = sshll.u32 %s554_s15, 3  ;;  %s388_s28 = sshll.u32 %s137_s26, 3 }
  0x10   : > { %s146_s4 = scalar_lea.hbm %s714_s0, %s404_s27  ;;  %s141_s6 = scalar_lea.vmem [#allocation2], %s388_s28 }
  0x11   : > { %s148_s5 = sshll.u32 %s146_s4, 4  ;;  %s150_s7 = sshll.u32 %s141_s6, 4  ;;  %s149_s5 = int_to_ptr.hbm [resolvable:$true] %s148_s5  ;;  %s151_s7 = int_to_ptr.vmem [resolvable:$true] %s150_s7 }
  0x12   : > { %p642_p13 = pnand %p418_p10, %p616_p5  ;;  %p391_p0 = scmp.ge.s32.totalorder %s554_s15, 1 }
  0x13   : > { %p155_p1 = scmp.lt.s32.totalorder %s554_s15, 3  ;;  %s138_s9 = scalar_lea.sflag [#allocation3], %s137_s26 }
  0x14   : > { %s458_s10 = sshra.s32 %s149_s5, 4  ;;  %p462_p3 = pneg %p642_p13  ;;  %s459_s10 = int_to_ptr.hbm [resolvable:$true] %s458_s10 }
  0x15   : > { %s460_s11 = scalar_lea.hbm %s459_s10, 8  ;;  %s465_s20 = scalar_lea.hbm %s714_s0, 16 }
  0x16   : > { %p461_p2 = scmp.ne.s32.totalorder %s459_s10, %s460_s11  ;;  %p466_p5 = scmp.lt.s32.totalorder %s459_s10, %s714_s0 }
  0x17   : > { %p467_p8 = scmp.lt.s32.totalorder %s465_s20, %s460_s11 }
  0x18   : > { %p463_p4 = pnand %p462_p3, %p461_p2 }
  0x19   : > { %p468_p10 = por %p467_p8, %p466_p5 }
  0x1a   : > { %p464_p7 = pneg %p463_p4 }
  0x1c   : > { %p469_p9 = pnand %p468_p10, %p464_p7 }
  0x1e   : > { %472 = shalt.err (!%p469_p9)
}
  0x1f   : > { %413 = dma.hbm_to_vmem [thread:$0]  (!%p642_p13), %s149_s5, 128, %s151_s7, %s138_s9  }
  0x20   : > { %p156_p2 = pnand %p391_p0, %p155_p1 }
  0x21   : > { %s663_s26 = sand.u32 (!%p156_p2), 1, %s546_s13  }
  0x22   : > { %159 = sbr.rel (%p156_p2) target bundleno = 578 (0x242), region = 32  ;;  %s392_s28 = sshll.u32 (!%p156_p2), %s663_s26, 3 }
  0x23   : > { %s162_s29 = scalar_lea.sflag (!%p156_p2), [#allocation3], %s663_s26  ;;  %s165_s30 = scalar_lea.vmem (!%p156_p2), [#allocation2], %s392_s28 }
  0x27   : > { %533 = dma.done.wait (%p620_p6), %s162_s29, 128  }
  0x28   : > { %535 = vsyncadd (%p620_p6), %s162_s29, 4294967168  ;;  %v189_v0 = vld [vmem:[%s165_s30] sm:$0xff]  ;;  %vm196_vm0 = vcmask 1043456   ;;  %v203_v6 = vld [vmem:[%s715_s1] sm:$0xf]  ;;  %v205_v7 = vlaneseq  ;;  %vm208_vm1 = vcmask 31744  }
  0x29   : > { %191 = vst [vmem:[#allocation1] ss:$2 sm:$0xff] %v189_v0  ;;  %394 = vmatpush.msk.msra.mxu0 %vm196_vm0, %v203_v6  ;;  %v235_v12 = vld [vmem:[%s716_s2] sm:$0x3]  ;;  %vm240_vm2 = vcmask 1041408   ;;  %vm236_vm3 = vcmask 15360  }
  0x2a   : > { %v206_v8 = vand.u32 127, %v205_v7  ;;  %396 = vmatpush.msk.msra.mxu1 %vm240_vm2, %v235_v12  ;;  %v285_v15 = vshrl.u32 %v205_v7, 7  ;;  %v556_v31 = vmov 839922192   ;;  %s405_s7 = sshll.u32 %s598_s16, 3  ;;  %s188_s11 = scalar_lea.vmem [#allocation5], %s392_s28 }
  0x2b   : > { %v292_v32 = vunpack.c.l.s4 %v556_v31  ;;  %s310_s10 = scalar_lea.hbm %s717_s3, %s405_s7  ;;  %s312_s17 = sshll.u32 %s188_s11, 4  ;;  %s313_s17 = int_to_ptr.vmem [resolvable:$true] %s312_s17 }
  0x2c   : > { %453 = vset.pattern.permute.xlu0 %v285_v15  ;;  %s314_s19 = sshll.u32 %s310_s10, 4  ;;  %s299_s20 = scalar_lea.sflag [#allocation4], %s663_s26  ;;  %s315_s19 = int_to_ptr.hbm [resolvable:$true] %s314_s19 }
  0x2d   : > { %v293_v33 = vunpack.c.0.s8 %v292_v32  ;;  %s502_s22 = sshra.s32 %s315_s19, 4  ;;  %s508_s30 = scalar_lea.hbm %s717_s3, 16  ;;  %s503_s22 = int_to_ptr.hbm [resolvable:$true] %s502_s22 }
  0x2e   : > { %s504_s16 = scalar_lea.hbm %s503_s22, 8  ;;  %p509_p0 = scmp.lt.s32.totalorder %s503_s22, %s717_s3 }
  0x2f   : > { %p505_p6 = scmp.ne.s32.totalorder %s503_s22, %s504_s16  ;;  %p510_p1 = scmp.lt.s32.totalorder %s508_s30, %s504_s16 }
  0x30   : > { %v192_v1 = vld.sshfl [vmem:[#allocation1] sm:$0xff pattern:$0x75316420]  ;;  %v193_v2 = vld.sshfl [vmem:[#allocation1 + $0x8] sm:$0xff pattern:$0x75316420] }
  0x31   : > { %v197_v3 = vsel %vm196_vm0, %v192_v1, 0.0  ;;  %v198_v4 = vsel %vm196_vm0, %v193_v2, 0.0  ;;  %p506_p9 = pnand %p505_p6, %p627_p11  ;;  %p511_p3 = por %p510_p1, %p509_p0 }
  0x32   : > { %v199_v5 = vadd.f32 %v198_v4, %v197_v3 }
  0x33   : > { %p507_p13 = pneg %p506_p9 }
  0x34   : > { %200 = vadd.xlane.f32.xlu0 %v199_v5 }
  0x35   : > { %p512_p4 = pnand %p511_p3, %p507_p13 }
  0xa7   : > { %v201_v9 = vpop.xlane.xlu0 %200 }
  0xa8   : > { %v202_v10 = vmul.f32 0.00390625, %v201_v9 }
  0xaa   : > { %v207_v11 = vperm.slane %v202_v10, %v206_v8 }
  0xac   : > { %395 = vmatmul.msk.f32.vlgmr.msra.gmra.mxu0 %vm208_vm1, %v207_v11 }
 0x129   : > { %v231_v13 = vpop.f32.mrf.mxu0 }
 0x12a   : > { %v234_v14 = vmax.f32 %v231_v13, 0.0 }
 0x12c   : > { %397 = vmatmul.msk.f32.vlgmr.msra.gmra.mxu1 %vm236_vm3, %v234_v14 }
 0x1a9   : > { %v261_v16 = vpop.f32.mrf.mxu1 }
 0x1aa   : > { %v398_v17 = vmul.f32 -1.442695, %v261_v16 }
 0x1ac   : > { %454 = vpow2.f32 %v398_v17 }
 0x1b2   : > { %v455_v18 = vpop.eup %454 }
 0x1b3   : > { %v267_v19 = vadd.f32 1.0, %v455_v18 }
 0x1b5   : > { %456 = vrcp.f32 %v267_v19  ;;  %v279_v23 = vand.u32 2147483648, %v267_v19  ;;  %v277_v25 = vand.u32 2147483647, %v267_v19  ;;  %vm273_vm5 = vweird.f32 %v267_v19 }
 0x1b7   : > { %v280_v27 = vor.u32 1.1754944e-38, %v279_v23  ;;  %vm278_vm7 = vcmp.eq.f32.partialorder %v277_v25, 8.507059e+37 }
 0x1bb   : > { %v457_v20 = vpop.eup %456 }
 0x1bc   : > { %v269_v21 = vmul.f32 %v457_v20, %v267_v19  ;;  %vm274_vm4 = vweird.f32 %v457_v20 }
 0x1bd   : > { %vm275_vm6 = vmor %vm273_vm5, %vm274_vm4 }
 0x1be   : > { %v270_v22 = vsub.f32 1.0, %v269_v21 }
 0x1c0   : > { %v271_v24 = vmul.f32 %v457_v20, %v270_v22 }
 0x1c2   : > { %v272_v26 = vadd.f32 %v457_v20, %v271_v24 }
 0x1c4   : > { %v276_v28 = vsel %vm275_vm6, %v457_v20, %v272_v26 }
 0x1c5   : > { %v281_v29 = vsel %vm278_vm7, %v280_v27, %v276_v28 }
 0x1c6   : > { %v283_v30 = vperm.slane %v281_v29, 0 }
 0x1c8   : > { %288 = vperm.xlu0 %453, %v283_v30  }
 0x23a   : > { %v289_v34 = vpop.permute.xlu0 %288 }
 0x23b   : > { %v294_v35 = vperm.slane %v289_v34, %v293_v33 }
 0x23d   : > { %v296_v36 = vmul.f32 %v294_v35, %v189_v0 }
 0x23f   : > { %297 = vst [vmem:[%s188_s11] sm:$0xff] %v296_v36 }
 0x240   : > { %515 = shalt.err (!%p512_p4)
}
 0x241   : > { %408 = dma.vmem_to_hbm [thread:$0]  (%p627_p11), %s313_s17, 128, %s315_s19, %s299_s20  }
 0x242 PF: > { %s326_s26 = sand.u32 1, %s542_s12   ;;  %p723_p7 = scmp.ge.s32.totalorder %s554_s15, 2 }
 0x243   : > { %s327_s5 = scalar_lea.sflag [#allocation4], %s326_s26 }
 0x244   : > { %p415_p5 = pnand %p723_p7, %p631_p12 }
 0x246   : > { %p416_p8 = pneg %p415_p5 }
 0x248   : > { %537 = dma.done.wait (%p416_p8), %s327_s5, 128  }
 0x249   : > { %539 = vsyncadd (%p416_p8), %s327_s5, 4294967168  ;;  %p16_p10 = scmp.ge.s32.totalorder %s602_s18, 4   ;;  %s724_s12 = smov %s546_s13 }
 0x24a   : > { %s725_s13 = smov %s550_s14  ;;  %s726_s14 = smov %s614_s21 }
 0x24b   : > { %s727_s15 = smov %s602_s18  ;;  %18 = sbr.rel (!%p16_p10) target bundleno = 5 (0x5), region = 77 }
 0x250   :  { %333 = vsyncpa [#allocation3], 1 }
 0x251   :  { %335 = vsyncpa [#allocation3 + $0x1], 1 }
 0x252   :  { %336 = vsyncpa [#allocation4], 1 }
 0x253   :  { %338 = vsyncpa [#allocation4 + $0x1], 1 }

</bundles_post_ra>
